<compile_context>
chip_gen: v7x
topology: tpu7x:2x2x1
jax: 0.10.0
libtpu: 0.0.40
codegen_flags: <defaults>
</compile_context>

<pallas_src>
import functools

import jax
import jax.numpy as jnp
from jax.experimental import pallas as pl
from jax.experimental.pallas import tpu as pltpu

SUBLANE = 8
CHUNK = 128                 # rows per in-kernel sub-chunk (bounds vreg live range)
H1, H2, H3 = 128, 256, 64   # hidden widths from the PyTorch module


def _round_up(x, m):
    return ((x + m - 1) // m) * m


def dqn_linear_kernel(x_ref, w1_ref, b1_ref, w2_ref, b2_ref,
                      w3_ref, b3_ref, w4_ref, b4_ref, o_ref,
                      *, chunk_rows, n_chunks):
    """Fused forward: relu(L1) -> relu(L2) -> relu(L3) -> L4 for one batch tile.

    All four matmuls run bf16 x bf16 on the MXU with f32 accumulation; bias adds and
    ReLUs run in f32 on the VPU, then activations are cast back to bf16 for the next
    MXU pass.  The tile is processed in `n_chunks` sub-chunks of `chunk_rows` rows so
    per-chunk f32 activations fit the vreg file (important on v5e).
    """
    def mlp(x_bf16):
        h = jnp.dot(x_bf16, w1_ref[...], preferred_element_type=jnp.float32) + b1_ref[...]
        h = jnp.maximum(h, 0.0).astype(jnp.bfloat16)
        h = jnp.dot(h, w2_ref[...], preferred_element_type=jnp.float32) + b2_ref[...]
        h = jnp.maximum(h, 0.0).astype(jnp.bfloat16)
        h = jnp.dot(h, w3_ref[...], preferred_element_type=jnp.float32) + b3_ref[...]
        h = jnp.maximum(h, 0.0).astype(jnp.bfloat16)
        return jnp.dot(h, w4_ref[...], preferred_element_type=jnp.float32) + b4_ref[...]

    if n_chunks == 1:
        o_ref[...] = mlp(x_ref[...].astype(jnp.bfloat16)).astype(o_ref.dtype)
    else:
        def body(ci, carry):
            r0 = pl.multiple_of(ci * chunk_rows, chunk_rows)
            q = mlp(x_ref[pl.ds(r0, chunk_rows), :].astype(jnp.bfloat16))
            o_ref[pl.ds(r0, chunk_rows), :] = q.astype(o_ref.dtype)
            return carry
        jax.lax.fori_loop(0, n_chunks, body, 0, unroll=True)


def _choose_tile(batch):
    """Pick (tile_rows, chunk_rows, n_chunks) for the batch grid."""
    if batch <= CHUNK:
        tb = _round_up(max(batch, 1), SUBLANE)
        return tb, tb, 1
    # >= ~4 grid steps for v7x dual-TC sharding + pipelining; tile rows a multiple of
    # CHUNK so the in-kernel chunk loop is uniform; capped at 512 rows.
    tb = min(4 * CHUNK, _round_up(pl.cdiv(batch, 4), CHUNK))
    return tb, CHUNK, tb // CHUNK


def dqn_linear_forward(x, params):
    """x: (B, num_inputs) float32.  params: un-padded bf16 weights / f32 biases."""
    B, num_inputs = x.shape
    num_actions = params["w4"].shape[1]

    tb, chunk_rows, n_chunks = _choose_tile(B)
    grid = (pl.cdiv(B, tb),)   # ragged last block handled by Pallas masking

    def resident(arr):
        # Full-array block, constant block index => DMA'd once, VMEM-resident.
        return pl.BlockSpec(arr.shape, lambda i: (0, 0))

    in_specs = [
        pl.BlockSpec((tb, num_inputs), lambda i: (i, 0)),   # x tile, natural width
        resident(params["w1"]), resident(params["b1"]),
        resident(params["w2"]), resident(params["b2"]),
        resident(params["w3"]), resident(params["b3"]),
        resident(params["w4"]), resident(params["b4"]),
    ]
    out_spec = pl.BlockSpec((tb, num_actions), lambda i: (i, 0))

    kernel = functools.partial(dqn_linear_kernel,
                               chunk_rows=chunk_rows, n_chunks=n_chunks)

    return pl.pallas_call(
        kernel,
        out_shape=jax.ShapeDtypeStruct((B, num_actions), jnp.float32),
        grid=grid,
        in_specs=in_specs,
        out_specs=out_spec,
        compiler_params=pltpu.CompilerParams(
            dimension_semantics=("parallel",)),   # batch tiles shard across TCs (v7x)
    )(x,
      params["w1"], params["b1"],
      params["w2"], params["b2"],
      params["w3"], params["b3"],
      params["w4"], params["b4"])


def init_params(key, num_inputs, num_actions):
    """Init mirroring nn.Linear's default U(-1/sqrt(fan_in), 1/sqrt(fan_in)).

    Weights are stored transposed relative to PyTorch, shape (in, out), in bf16 and
    completely un-padded.  Biases stay f32 (added to the f32 accumulator), shape (1, out).
    """
    layers = [(num_inputs, H1), (H1, H2), (H2, H3), (H3, num_actions)]
    params = {}
    keys = jax.random.split(key, 2 * len(layers))
    for i, (fi, fo) in enumerate(layers):
        bound = 1.0 / (fi ** 0.5)
        w = jax.random.uniform(keys[2 * i], (fi, fo),
                               minval=-bound, maxval=bound, dtype=jnp.float32)
        b = jax.random.uniform(keys[2 * i + 1], (1, fo),
                               minval=-bound, maxval=bound, dtype=jnp.float32)
        params[f"w{i + 1}"] = w.astype(jnp.bfloat16)
        params[f"b{i + 1}"] = b
    return params


def reference_forward(x, params):
    """Plain-JAX reference mimicking the kernel's bf16-in / f32-accumulate math."""
    h = x.astype(jnp.bfloat16).astype(jnp.float32)

    def hidden(h, w, b):
        y = jnp.maximum(h @ w.astype(jnp.float32) + b, 0.0)
        return y.astype(jnp.bfloat16).astype(jnp.float32)

    h = hidden(h, params["w1"], params["b1"])
    h = hidden(h, params["w2"], params["b2"])
    h = hidden(h, params["w3"], params["b3"])
    return h @ params["w4"].astype(jnp.float32) + params["b4"]


if __name__ == "__main__":
    key = jax.random.PRNGKey(0)
    k_param, k_x1, k_x2 = jax.random.split(key, 3)

    num_inputs = 8     # e.g. a small gym env observation size
    num_actions = 4    # e.g. a small discrete action space
    params = init_params(k_param, num_inputs, num_actions)

    # Primary spec-sized run: batch=2 -> single grid step, single chunk.
    x_small = jax.random.normal(k_x1, (2, num_inputs), dtype=jnp.float32)
    out_small = jax.block_until_ready(dqn_linear_forward(x_small, params))
    ref_small = reference_forward(x_small, params)
    assert out_small.shape == (2, num_actions)
    assert jnp.allclose(out_small, ref_small, atol=1e-2, rtol=1e-2), \
        float(jnp.max(jnp.abs(out_small - ref_small)))

    # Secondary run exercising multi-step grid, ragged last block and the unrolled
    # 128-row chunk loop (B=600 -> tb=256, grid=(3,), n_chunks=2, last block ragged).
    x_big = jax.random.normal(k_x2, (600, num_inputs), dtype=jnp.float32)
    out_big = jax.block_until_ready(dqn_linear_forward(x_big, params))
    ref_big = reference_forward(x_big, params)
    assert out_big.shape == (600, num_actions)
    assert jnp.allclose(out_big, ref_big, atol=1e-2, rtol=1e-2), \
        float(jnp.max(jnp.abs(out_big - ref_big)))

    print("KERNEL_OK")
</pallas_src>

<mosaic_0001>
module attributes {stable_mosaic.version = 11 : i64} {
  func.func @dqn_linear_kernel(%arg0: i32, %arg1: memref<8x8xf32, #tpu.memory_space<vmem>>, %arg2: memref<8x128xbf16, #tpu.memory_space<vmem>>, %arg3: memref<1x128xf32, #tpu.memory_space<vmem>>, %arg4: memref<128x256xbf16, #tpu.memory_space<vmem>>, %arg5: memref<1x256xf32, #tpu.memory_space<vmem>>, %arg6: memref<256x64xbf16, #tpu.memory_space<vmem>>, %arg7: memref<1x64xf32, #tpu.memory_space<vmem>>, %arg8: memref<64x4xbf16, #tpu.memory_space<vmem>>, %arg9: memref<1x4xf32, #tpu.memory_space<vmem>>, %arg10: memref<8x4xf32, #tpu.memory_space<vmem>>) attributes {dimension_semantics = [#tpu.dimension_semantics<parallel>], iteration_bounds = array<i64: 1>, scalar_prefetch = 0 : i64, scratch_operands = 0 : i64, tpu.core_type = #tpu.core_type<tc>, window_params = [{transform_indices = @transform_0, window_bounds = array<i64: 8, 8>}, {pipeline_mode = #tpu.pipeline_mode<synchronous>, transform_indices = @transform_1, window_bounds = array<i64: 8, 128>}, {pipeline_mode = #tpu.pipeline_mode<synchronous>, transform_indices = @transform_2, window_bounds = array<i64: 1, 128>}, {pipeline_mode = #tpu.pipeline_mode<synchronous>, transform_indices = @transform_3, window_bounds = array<i64: 128, 256>}, {pipeline_mode = #tpu.pipeline_mode<synchronous>, transform_indices = @transform_4, window_bounds = array<i64: 1, 256>}, {pipeline_mode = #tpu.pipeline_mode<synchronous>, transform_indices = @transform_5, window_bounds = array<i64: 256, 64>}, {pipeline_mode = #tpu.pipeline_mode<synchronous>, transform_indices = @transform_6, window_bounds = array<i64: 1, 64>}, {pipeline_mode = #tpu.pipeline_mode<synchronous>, transform_indices = @transform_7, window_bounds = array<i64: 64, 4>}, {pipeline_mode = #tpu.pipeline_mode<synchronous>, transform_indices = @transform_8, window_bounds = array<i64: 1, 4>}, {transform_indices = @transform_9, window_bounds = array<i64: 8, 4>}]} {
    %c0 = arith.constant 0 : index
    %c0_0 = arith.constant 0 : index
    %0 = vector.load %arg1[%c0, %c0_0] : memref<8x8xf32, #tpu.memory_space<vmem>>, vector<8x8xf32>
    %1 = arith.truncf %0 : vector<8x8xf32> to vector<8x8xbf16>
    %c0_1 = arith.constant 0 : index
    %c0_2 = arith.constant 0 : index
    %2 = vector.load %arg2[%c0_1, %c0_2] : memref<8x128xbf16, #tpu.memory_space<vmem>>, vector<8x128xbf16>
    %cst = arith.constant dense<0.000000e+00> : vector<8x128xf32>
    %3 = tpu.matmul %1, %2, %cst {dimension_numbers = #tpu.dot_dimension_numbers<[1], [0], [0], [1], [0, 0, 1, 1], [], []>} : vector<8x8xbf16>, vector<8x128xbf16>, vector<8x128xf32> -> vector<8x128xf32>
    %c0_3 = arith.constant 0 : index
    %c0_4 = arith.constant 0 : index
    %4 = vector.load %arg3[%c0_3, %c0_4] : memref<1x128xf32, #tpu.memory_space<vmem>>, vector<1x128xf32>
    %5 = vector.broadcast %4 : vector<1x128xf32> to vector<8x128xf32>
    %6 = arith.addf %3, %5 : vector<8x128xf32>
    %cst_5 = arith.constant 0.000000e+00 : f32
    %7 = vector.broadcast %cst_5 : f32 to vector<8x128xf32>
    %8 = arith.maximumf %6, %7 : vector<8x128xf32>
    %9 = arith.truncf %8 : vector<8x128xf32> to vector<8x128xbf16>
    %c0_6 = arith.constant 0 : index
    %c0_7 = arith.constant 0 : index
    %10 = vector.load %arg4[%c0_6, %c0_7] : memref<128x256xbf16, #tpu.memory_space<vmem>>, vector<128x256xbf16>
    %cst_8 = arith.constant dense<0.000000e+00> : vector<8x256xf32>
    %11 = tpu.matmul %9, %10, %cst_8 {dimension_numbers = #tpu.dot_dimension_numbers<[1], [0], [0], [1], [0, 0, 1, 1], [], []>} : vector<8x128xbf16>, vector<128x256xbf16>, vector<8x256xf32> -> vector<8x256xf32>
    %c0_9 = arith.constant 0 : index
    %c0_10 = arith.constant 0 : index
    %12 = vector.load %arg5[%c0_9, %c0_10] : memref<1x256xf32, #tpu.memory_space<vmem>>, vector<1x256xf32>
    %13 = vector.broadcast %12 : vector<1x256xf32> to vector<8x256xf32>
    %14 = arith.addf %11, %13 : vector<8x256xf32>
    %cst_11 = arith.constant 0.000000e+00 : f32
    %15 = vector.broadcast %cst_11 : f32 to vector<8x256xf32>
    %16 = arith.maximumf %14, %15 : vector<8x256xf32>
    %17 = arith.truncf %16 : vector<8x256xf32> to vector<8x256xbf16>
    %c0_12 = arith.constant 0 : index
    %c0_13 = arith.constant 0 : index
    %18 = vector.load %arg6[%c0_12, %c0_13] : memref<256x64xbf16, #tpu.memory_space<vmem>>, vector<256x64xbf16>
    %cst_14 = arith.constant dense<0.000000e+00> : vector<8x64xf32>
    %19 = tpu.matmul %17, %18, %cst_14 {dimension_numbers = #tpu.dot_dimension_numbers<[1], [0], [0], [1], [0, 0, 1, 1], [], []>} : vector<8x256xbf16>, vector<256x64xbf16>, vector<8x64xf32> -> vector<8x64xf32>
    %c0_15 = arith.constant 0 : index
    %c0_16 = arith.constant 0 : index
    %20 = vector.load %arg7[%c0_15, %c0_16] : memref<1x64xf32, #tpu.memory_space<vmem>>, vector<1x64xf32>
    %21 = vector.broadcast %20 : vector<1x64xf32> to vector<8x64xf32>
    %22 = arith.addf %19, %21 : vector<8x64xf32>
    %cst_17 = arith.constant 0.000000e+00 : f32
    %23 = vector.broadcast %cst_17 : f32 to vector<8x64xf32>
    %24 = arith.maximumf %22, %23 : vector<8x64xf32>
    %25 = arith.truncf %24 : vector<8x64xf32> to vector<8x64xbf16>
    %c0_18 = arith.constant 0 : index
    %c0_19 = arith.constant 0 : index
    %26 = vector.load %arg8[%c0_18, %c0_19] : memref<64x4xbf16, #tpu.memory_space<vmem>>, vector<64x4xbf16>
    %cst_20 = arith.constant dense<0.000000e+00> : vector<8x4xf32>
    %27 = tpu.matmul %25, %26, %cst_20 {dimension_numbers = #tpu.dot_dimension_numbers<[1], [0], [0], [1], [0, 0, 1, 1], [], []>} : vector<8x64xbf16>, vector<64x4xbf16>, vector<8x4xf32> -> vector<8x4xf32>
    %c0_21 = arith.constant 0 : index
    %c0_22 = arith.constant 0 : index
    %28 = vector.load %arg9[%c0_21, %c0_22] : memref<1x4xf32, #tpu.memory_space<vmem>>, vector<1x4xf32>
    %29 = vector.broadcast %28 : vector<1x4xf32> to vector<8x4xf32>
    %30 = arith.addf %27, %29 : vector<8x4xf32>
    %c0_23 = arith.constant 0 : index
    %c0_24 = arith.constant 0 : index
    %31 = vector.load %arg10[%c0_23, %c0_24] : memref<8x4xf32, #tpu.memory_space<vmem>>, vector<8x4xf32>
    tpu.vector_store %arg10[%c0_23, %c0_24], %30 {strides = array<i32>} : memref<8x4xf32, #tpu.memory_space<vmem>>, vector<8x4xf32>,
    return
  }
  func.func @transform_0(%arg0: i32) -> (i32, i32) {
    %c0_i32 = arith.constant 0 : i32
    %c0_i32_0 = arith.constant 0 : i32
    return %arg0, %c0_i32 : i32, i32
  }
  func.func @transform_1(%arg0: i32) -> (i32, i32) {
    %c0_i32 = arith.constant 0 : i32
    %c0_i32_0 = arith.constant 0 : i32
    %c0_i32_1 = arith.constant 0 : i32
    return %c0_i32, %c0_i32_0 : i32, i32
  }
  func.func @transform_2(%arg0: i32) -> (i32, i32) {
    %c0_i32 = arith.constant 0 : i32
    %c0_i32_0 = arith.constant 0 : i32
    %c0_i32_1 = arith.constant 0 : i32
    return %c0_i32, %c0_i32_0 : i32, i32
  }
  func.func @transform_3(%arg0: i32) -> (i32, i32) {
    %c0_i32 = arith.constant 0 : i32
    %c0_i32_0 = arith.constant 0 : i32
    %c0_i32_1 = arith.constant 0 : i32
    return %c0_i32, %c0_i32_0 : i32, i32
  }
  func.func @transform_4(%arg0: i32) -> (i32, i32) {
    %c0_i32 = arith.constant 0 : i32
    %c0_i32_0 = arith.constant 0 : i32
    %c0_i32_1 = arith.constant 0 : i32
    return %c0_i32, %c0_i32_0 : i32, i32
  }
  func.func @transform_5(%arg0: i32) -> (i32, i32) {
    %c0_i32 = arith.constant 0 : i32
    %c0_i32_0 = arith.constant 0 : i32
    %c0_i32_1 = arith.constant 0 : i32
    return %c0_i32, %c0_i32_0 : i32, i32
  }
  func.func @transform_6(%arg0: i32) -> (i32, i32) {
    %c0_i32 = arith.constant 0 : i32
    %c0_i32_0 = arith.constant 0 : i32
    %c0_i32_1 = arith.constant 0 : i32
    return %c0_i32, %c0_i32_0 : i32, i32
  }
  func.func @transform_7(%arg0: i32) -> (i32, i32) {
    %c0_i32 = arith.constant 0 : i32
    %c0_i32_0 = arith.constant 0 : i32
    %c0_i32_1 = arith.constant 0 : i32
    return %c0_i32, %c0_i32_0 : i32, i32
  }
  func.func @transform_8(%arg0: i32) -> (i32, i32) {
    %c0_i32 = arith.constant 0 : i32
    %c0_i32_0 = arith.constant 0 : i32
    %c0_i32_1 = arith.constant 0 : i32
    return %c0_i32, %c0_i32_0 : i32, i32
  }
  func.func @transform_9(%arg0: i32) -> (i32, i32) {
    %c0_i32 = arith.constant 0 : i32
    %c0_i32_0 = arith.constant 0 : i32
    return %arg0, %c0_i32 : i32, i32
  }
}

</mosaic_0001>

<bundles_post_ra>
// kernel: tpu_custom_call.1
= control target key start
LH: loop header
LB: loop body
LE: loop exit
PB: predicated region body
PF: predicated region fallthrough
CT: control target
= control target key end

     0   :  { %14 = vsyncpa [#allocation3], 0  ;;  %vm48_vm0 = vcmask 1043456   ;;  %v687_v1 = vmov 0.0   ;;  %vm688_vm1 = vmmov 0   ;;  %vm44_vm2 = vcmask 64512   ;;  %s890_s0 = inlined_call_operand.vmem [shape: f32[2,8], index: 0, kind: input, shape index: {}]   ;;  %s891_s1 = inlined_call_operand.vmem [shape: bf16[8,128], index: 1, kind: input, shape index: {}]   ;;  %s892_s2 = inlined_call_operand.vmem [shape: f32[1,128], index: 2, kind: input, shape index: {}]   ;;  %s893_s3 = inlined_call_operand.vmem [shape: bf16[128,256], index: 3, kind: input, shape index: {}]   ;;  %s894_s4 = inlined_call_operand.vmem [shape: f32[1,256], index: 4, kind: input, shape index: {}]   ;;  %s895_s5 = inlined_call_operand.vmem [shape: bf16[256,64], index: 5, kind: input, shape index: {}]   ;;  %s896_s6 = inlined_call_operand.vmem [shape: f32[1,64], index: 6, kind: input, shape index: {}]   ;;  %s897_s7 = inlined_call_operand.vmem [shape: bf16[64,4], index: 7, kind: input, shape index: {}]   ;;  %s898_s8 = inlined_call_operand.vmem [shape: f32[1,4], index: 8, kind: input, shape index: {}]   ;;  %s899_s9 = inlined_call_operand.hbm [shape: f32[2,4], index: 9, kind: output, shape index: {}]  }
   0x1   :  { %v36_v0 = vld [vmem:[%s891_s1] sm:$0xf]  ;;  %595 = vmatprep.subr.bf16.mxu0 %v687_v1  ;;  %597 = vmatprep.mubr.msk.bf16.mxu0 %vm688_vm1, %v687_v1  ;;  %v619_v5 = vld [vmem:[%s893_s3 + $0x4] ss:$8 sps:$4 sm:$0xff]   ;;  %v622_v7 = vld [vmem:[%s893_s3 + $0x14] ss:$8 sps:$4 sm:$0xff]   ;;  %v112_v48 = vlaneseq }
   0x2   :  { %v50_v2 = vsel %vm48_vm0, %v36_v0, 0  ;;  %v34_v3 = vld [vmem:[%s890_s0] sm:$0xff]  ;;  %202 = vmatprep.subr.bf16.mxu1 %v619_v5  ;;  %v624_v8 = vld [vmem:[%s893_s3 + $0x10] ss:$8 sps:$4 sm:$0xff]   ;;  %v628_v11 = vld [vmem:[%s893_s3 + $0x34] ss:$8 sps:$4 sm:$0xff]  }
   0x3   :  { %596 = vmatpush3.bf16.msra.mxu0 %v50_v2  ;;  %v35_v4 = vpack.c.bf16 %v34_v3, %v34_v3  ;;  %v621_v6 = vld [vmem:[%s893_s3] ss:$8 sps:$4 sm:$0xff]   ;;  %v625_v9 = vld [vmem:[%s893_s3 + $0x24] ss:$8 sps:$4 sm:$0xff]   ;;  %v630_v12 = vld [vmem:[%s893_s3 + $0x30] ss:$8 sps:$4 sm:$0xff]  }
   0x4   :  { %203 = vmatpush1.bf16.msra.mxu1 %v621_v6  ;;  %v627_v10 = vld [vmem:[%s893_s3 + $0x20] ss:$8 sps:$4 sm:$0xff]   ;;  %v631_v13 = vld [vmem:[%s893_s3 + $0x44] ss:$8 sps:$4 sm:$0xff]   ;;  %v634_v15 = vld [vmem:[%s893_s3 + $0x54] ss:$8 sps:$4 sm:$0xff]  }
   0x5   :  { %204 = vmatprep.subr.bf16.mxu1 %v622_v7  ;;  %v633_v14 = vld [vmem:[%s893_s3 + $0x40] ss:$8 sps:$4 sm:$0xff]   ;;  %v636_v16 = vld [vmem:[%s893_s3 + $0x50] ss:$8 sps:$4 sm:$0xff]   ;;  %v637_v17 = vld [vmem:[%s893_s3 + $0x64] ss:$8 sps:$4 sm:$0xff]  }
   0x6   :  { %598 = vmatmul.mubr.msk.bf16.vlgmr.msra.gmra.mrb[0].mxu0 %vm44_vm2, %v35_v4  ;;  %v639_v18 = vld [vmem:[%s893_s3 + $0x60] ss:$8 sps:$4 sm:$0xff]   ;;  %v640_v19 = vld [vmem:[%s893_s3 + $0x74] ss:$8 sps:$4 sm:$0xff]   ;;  %v642_v20 = vld [vmem:[%s893_s3 + $0x70] ss:$8 sps:$4 sm:$0xff]  }
   0x7   :  { %v689_v21 = vmov 0   ;;  %v643_v22 = vld [vmem:[%s895_s5 + $0x40] sm:$0xff]   ;;  %v645_v24 = vld [vmem:[%s895_s5 + $0x48] sm:$0xff]   ;;  %v647_v26 = vld [vmem:[%s895_s5 + $0x50] sm:$0xff]   ;;  %v113_v49 = vshrl.u32 %v112_v48, 7  ;;  %vm463_vm3 = vcmask 523264  }
   0x8   :  { %205 = vmatpush1.bf16.msra.mxu1 %v624_v8  ;;  %234 = vmatprep.mubr.bf16.mxu1 %v689_v21  ;;  %v644_v23 = vld [vmem:[%s895_s5] sm:$0xff]   ;;  %v646_v25 = vld [vmem:[%s895_s5 + $0x8] sm:$0xff]   ;;  %v648_v27 = vld [vmem:[%s895_s5 + $0x10] sm:$0xff]   ;;  %vm507_vm4 = vcmask 31744  }
   0x9   :  { %206 = vmatprep.subr.bf16.mxu1 %v625_v9  ;;  %568 = vmatprep.subr.bf16.mxu0 %v643_v22  ;;  %v649_v28 = vld [vmem:[%s895_s5 + $0x58] sm:$0xff]   ;;  %v651_v30 = vld [vmem:[%s895_s5 + $0x60] sm:$0xff]   ;;  %v653_v32 = vld [vmem:[%s895_s5 + $0x68] sm:$0xff]   ;;  %v114_v50 = vsub.s32 0, %v113_v49  ;;  %v118_v52 = vsub.s32 1, %v113_v49 }
   0xa   :  { %569 = vmatpush3.bf16.msra.mxu0 %v644_v23  ;;  %v650_v29 = vld [vmem:[%s895_s5 + $0x18] sm:$0xff]   ;;  %v652_v31 = vld [vmem:[%s895_s5 + $0x20] sm:$0xff]   ;;  %v654_v33 = vld [vmem:[%s895_s5 + $0x28] sm:$0xff]  }
   0xb   :  { %570 = vmatprep.subr.bf16.mxu0 %v645_v24  ;;  %v525_v34 = vld [vmem:[%s892_s2] ss:$0 sm:$0xff]  ;;  %v655_v42 = vld [vmem:[%s895_s5 + $0x70] sm:$0xff]   ;;  %v657_v44 = vld [vmem:[%s895_s5 + $0x78] sm:$0xff]  }
   0xc   :  { %207 = vmatpush1.bf16.msra.mxu1 %v627_v10  ;;  %v656_v43 = vld [vmem:[%s895_s5 + $0x30] sm:$0xff]   ;;  %v658_v45 = vld [vmem:[%s895_s5 + $0x38] sm:$0xff]   ;;  %v659_v46 = vld [vmem:[%s897_s7] sm:$0xff]  }
   0xd   :  { %208 = vmatprep.subr.bf16.mxu1 %v628_v11  ;;  %v660_v47 = vld [vmem:[%s897_s7 + $0x8] sm:$0xff]   ;;  %v110_v51 = vld [vmem:[%s894_s4] sm:$0x3]  ;;  %v661_v2 = vld [vmem:[%s897_s7 + $0x10] sm:$0xff]  }
   0xe   :  { %571 = vmatpush3.bf16.msra.mxu0 %v646_v25  ;;  %v115_v53 = vrot.slane %v110_v51, %v114_v50  ;;  %v119_v54 = vrot.slane %v110_v51, %v118_v52  ;;  %v662_v3 = vld [vmem:[%s897_s7 + $0x18] sm:$0xff]   ;;  %v543_v5 = vld [vmem:[%s896_s6] ss:$0 sm:$0xff] }
   0xf   :  { %572 = vmatprep.subr.bf16.mxu0 %v647_v26 }
  0x10   :  { %209 = vmatpush1.bf16.msra.mxu1 %v630_v12 }
  0x11   :  { %210 = vmatprep.subr.bf16.mxu1 %v631_v13 }
  0x12   :  { %573 = vmatpush3.bf16.msra.mxu0 %v648_v27 }
  0x13   :  { %574 = vmatprep.subr.bf16.mxu0 %v649_v28 }
  0x14   :  { %211 = vmatpush1.bf16.msra.mxu1 %v633_v14 }
  0x15   :  { %212 = vmatprep.subr.bf16.mxu1 %v634_v15 }
  0x16   :  { %575 = vmatpush3.bf16.msra.mxu0 %v650_v29 }
  0x17   :  { %576 = vmatprep.subr.bf16.mxu0 %v651_v30 }
  0x18   :  { %213 = vmatpush1.bf16.msra.mxu1 %v636_v16 }
  0x19   :  { %214 = vmatprep.subr.bf16.mxu1 %v637_v17 }
  0x1a   :  { %577 = vmatpush3.bf16.msra.mxu0 %v652_v31 }
  0x1b   :  { %578 = vmatprep.subr.bf16.mxu0 %v653_v32 }
  0x1c   :  { %215 = vmatpush1.bf16.msra.mxu1 %v639_v18 }
  0x1d   :  { %216 = vmatprep.subr.bf16.mxu1 %v640_v19 }
  0x1e   :  { %579 = vmatpush3.bf16.msra.mxu0 %v654_v33 }
  0x1f   :  { %580 = vmatprep.subr.bf16.mxu0 %v655_v42 }
  0x20   :  { %217 = vmatpush1.bf16.msra.mxu1 %v642_v20 }
  0x21   :  { %601 = vmatprep.subr.bf16.mxu1 %v687_v1 }
  0x22   :  { %581 = vmatpush3.bf16.msra.mxu0 %v656_v43 }
  0x23   :  { %582 = vmatprep.subr.bf16.mxu0 %v657_v44 }
  0x26   :  { %583 = vmatpush3.bf16.msra.mxu0 %v658_v45 }
  0xd9   :  { %v86_v35 = vpop.f32.mrb[0].mxu0 }
  0xda   :  { %v87_v36 = vadd.f32 %v525_v34, %v86_v35  ;;  %v599_v37 = vpop.f32.mrb[1].mxu0 }
  0xdb   :  { %v89_v38 = vpop.f32.mrb[2].mxu0 }
  0xdc   :  { %v92_v39 = vmax.f32 %v87_v36, 0.0  ;;  %v600_v40 = vpop.f32.mrb[3].mxu0 }
  0xde   :  { %v93_v41 = vpack.c.bf16 %v92_v39, %v92_v39 }
  0xe0   :  { %235 = vmatmul.mubr.bf16.vlgmr.msra.gmra.mrb[0].mxu1 %v93_v41 }
  0xe1   :  { %609 = vmatprep.mubr.msk.bf16.mxu1 %vm688_vm1, %v687_v1  ;;  %602 = vmatpush3.bf16.msra.mxu1 %v659_v46 }
  0xe2   :  { %603 = vmatprep.subr.bf16.mxu1 %v687_v1 }
  0xe5   :  { %604 = vmatpush3.bf16.msra.mxu1 %v660_v47 }
  0xe6   :  { %605 = vmatprep.subr.bf16.mxu1 %v687_v1 }
  0xe9   :  { %606 = vmatpush3.bf16.msra.mxu1 %v661_v2 }
  0xea   :  { %607 = vmatprep.subr.bf16.mxu1 %v687_v1  ;;  %v560_v1 = vld [vmem:[%s898_s8] ss:$0 sm:$0xff] }
  0xed   :  { %608 = vmatpush3.bf16.msra.mxu1 %v662_v3 }
 0x1b3   :  { %v236_v55 = vpop.f32.mrb[0].mxu1 }
 0x1b4   :  { %v237_v56 = vadd.f32 %v236_v55, %v115_v53  ;;  %v238_v57 = vpop.f32.mrb[1].mxu1 }
 0x1b5   :  { %v239_v58 = vadd.f32 %v238_v57, %v119_v54  ;;  %v240_v59 = vpop.f32.mrb[2].mxu1 }
 0x1b6   :  { %v243_v60 = vmax.f32 %v237_v56, 0.0  ;;  %v241_v61 = vpop.f32.mrb[3].mxu1 }
 0x1b7   :  { %v244_v62 = vmax.f32 %v239_v58, 0.0 }
 0x1b8   :  { %v245_v0 = vpack.c.bf16 %v243_v60, %v243_v60 }
 0x1b9   :  { %v246_v63 = vpack.c.bf16 %v244_v62, %v244_v62 }
 0x1bb   :  { %414 = vmatprep.mubr.bf16.mxu0 %v246_v63 }
 0x1bc   :  { %415 = vmatmul.mubr.bf16.vlgmr.msra.gmra.mrb[4].mxu0 %v245_v0 }
 0x28f   :  { %v584_v4 = vpop.f32.mrb[4].mxu0 }
 0x290   :  { %v585_v6 = vpop.f32.mrb[5].mxu0 }
 0x291   :  { %v586_v7 = vadd.f32 %v585_v6, %v584_v4  ;;  %v587_v8 = vpop.f32.mrb[6].mxu0 }
 0x292   :  { %v588_v9 = vpop.f32.mrb[7].mxu0 }
 0x293   :  { %v417_v10 = vadd.f32 %v586_v7, %v543_v5 }
 0x295   :  { %v422_v11 = vmax.f32 %v417_v10, 0.0 }
 0x297   :  { %v423_v12 = vpack.c.bf16 %v422_v11, %v422_v11 }
 0x299   :  { %610 = vmatmul.mubr.msk.bf16.vlgmr.msra.gmra.mrb[4].mxu1 %vm463_vm3, %v423_v12 }
 0x36c   :  { %v501_v13 = vpop.f32.mrb[4].mxu1 }
 0x36d   :  { %v502_v14 = vadd.f32 %v560_v1, %v501_v13  ;;  %v611_v15 = vpop.f32.mrb[5].mxu1 }
 0x36e   :  { %v504_v16 = vpop.f32.mrb[6].mxu1 }
 0x36f   :  { %508 = vst.msk [vmem:[#allocation2] sm:$0xff] %vm507_vm4, %v502_v14  ;;  %v612_v17 = vpop.f32.mrb[7].mxu1 }
 0x370   :  { %513 = vsyncadd [#allocation3], 96  ;;  %s690_s6 = smov [#allocation2]  }
 0x371   :  { %s514_s7 = sshll.u32 %s690_s6, 4  ;;  %s515_s7 = int_to_ptr.vmem [resolvable:$true] %s514_s7 }
 0x372   :  { %s663_s0 = scalar_lea.vmem %s515_s7, 32  ;;  %s667_s18 = scalar_lea.vmem %s515_s7, 128 }
 0x373   :  { %p664_p0 = scmp.ne.s32.totalorder %s515_s7, %s663_s0  ;;  %p668_p1 = scmp.lt.s32.totalorder %s515_s7, %s515_s7 }
 0x374   :  { %p669_p2 = scmp.lt.s32.totalorder %s667_s18, %s663_s0 }
 0x376   :  { %p670_p3 = por %p669_p2, %p668_p1 }
 0x378   :  { %p671_p4 = pnand %p670_p3, %p664_p0 }
 0x37a   :  { %674 = shalt.err (!%p671_p4)
}
 0x37b   :  { %s675_s20 = scalar_lea.hbm %s899_s9, 32 }
 0x37c   :  { %p676_p5 = scmp.ne.s32.totalorder %s899_s9, %s675_s20  ;;  %p679_p6 = scmp.lt.u32.totalorder %s675_s20, %s899_s9 }
 0x37e   :  { %p681_p7 = pnand %p679_p6, %p676_p5 }
 0x380   :  { %684 = shalt.err (!%p681_p7)
}
 0x381   :  { %s691_s25 = smov 32   ;;  %s692_s2 = smov 2  }
 0x382   :  { %520 = dma.vmem_to_hbm [thread:$0]  %s515_s7, 32, %s899_s9, [#allocation3], %s691_s25, %s691_s25, %s692_s2  }
 0x383   :  { %685 = dma.done.wait [#allocation3], 128  }
 0x384   :  { %686 = vsyncadd [#allocation3], 4294967168 }
 0x385   :  { %524 = vsyncpa [#allocation3], 1 }

</bundles_post_ra>
